<compile_context>
chip_gen: v7x
topology: tpu7x:2x2x1
jax: 0.10.0
libtpu: 0.0.40
codegen_flags: <defaults>
</compile_context>

<pallas_src>
import functools

import jax
import jax.numpy as jnp
from jax.experimental import pallas as pl
from jax.experimental.pallas import tpu as pltpu

# 16384 lane-columns per grid step = 128K batch elements (~1 MiB f32 input,
# ~6 MiB total double-buffered pipeline + intermediates).  Multiple of 128.
MAX_TILE_COLS = 16 * 1024


def _mlp_kernel(params_ref, x_ref, o_ref):
    """sigmoid(W2 @ sigmoid(W1 @ x + b1) + b2), elementwise on dense vregs.

    params layout (SMEM, f32[9]):
      [0..3] = W1 row-major (out=2, in=2) -> w1[j, k] = params[2*j + k]
      [4..5] = b1
      [6..7] = W2 (out=1, in=2)
      [8]    = b2
    x_ref: (16, cols_tile) -- rows 0..7 hold feature 0, rows 8..15 feature 1;
           batch element of (sublane s, global col c) is s*pad_cols + c.
    o_ref: (8, cols_tile) f32 -- same batch layout, sublane- and lane-dense.
    """
    x0 = x_ref[0:8, :].astype(jnp.float32)     # (8, cols_tile) feature 0
    x1 = x_ref[8:16, :].astype(jnp.float32)    # (8, cols_tile) feature 1

    # Layer 1 (2 hidden units) + sigmoid: scalar-broadcast FMAs on the VPU,
    # transcendentals on the EUP -- all free filler under the HBM bottleneck.
    h0 = jax.nn.sigmoid(x0 * params_ref[0] + x1 * params_ref[1] + params_ref[4])
    h1 = jax.nn.sigmoid(x0 * params_ref[2] + x1 * params_ref[3] + params_ref[5])

    # Layer 2 (1 output unit) + sigmoid.  Full (8, cols) unmasked dense store.
    o_ref[...] = jax.nn.sigmoid(
        h0 * params_ref[6] + h1 * params_ref[7] + params_ref[8])


def pack_params(w1, b1, w2, b2):
    """Pack the 9 real parameters once (hoisted out of the per-call path)."""
    return jnp.concatenate(
        [w1.reshape(-1), b1.reshape(-1), w2.reshape(-1), b2.reshape(-1)]
    ).astype(jnp.float32)


def _tiling(n, max_tile_cols):
    """Pick lane-column tile + padded column count for a batch of n rows."""
    assert max_tile_cols % 128 == 0
    cols_needed = max(pl.cdiv(n, 8), 1)                       # 8 batch/sublane
    cols_tile = min(max_tile_cols, pl.cdiv(cols_needed, 128) * 128)
    pad_cols = pl.cdiv(cols_needed, cols_tile) * cols_tile
    return cols_tile, pad_cols


def pack_inputs(x, *, max_tile_cols=MAX_TILE_COLS):
    """(N, 2) row-major -> sublane/lane-dense feature-major (16, pad_cols).

    One fused pad+transpose HBM pass, then a FREE row-major reshape:
    rows 0..7 are feature 0 (batch-major), rows 8..15 are feature 1.
    NOTE: producers that already emit feature-major (2, N) activations can
    build this layout with a pure reshape and skip the transpose pass.
    """
    n = x.shape[0]
    dtype = jnp.bfloat16 if x.dtype == jnp.bfloat16 else jnp.float32
    cols_tile, pad_cols = _tiling(n, max_tile_cols)
    pad_b = 8 * pad_cols
    xt = jnp.pad(x.astype(dtype).T, ((0, 0), (0, pad_b - n)))  # (2, pad_b)
    return xt.reshape(16, pad_cols), cols_tile


@functools.partial(jax.jit, static_argnames=("max_tile_cols",))
def example_net_forward(x, params, *, max_tile_cols=MAX_TILE_COLS):
    """x: (N, 2) f32/bf16, params: packed f32[9].  Returns (N, 1) f32."""
    n = x.shape[0]
    x_packed, cols_tile = pack_inputs(x, max_tile_cols=max_tile_cols)
    pad_cols = x_packed.shape[1]

    out = pl.pallas_call(
        _mlp_kernel,
        out_shape=jax.ShapeDtypeStruct((8, pad_cols), jnp.float32),
        grid=(pad_cols // cols_tile,),
        in_specs=[
            pl.BlockSpec(memory_space=pltpu.MemorySpace.SMEM),   # 9 scalars
            pl.BlockSpec((16, cols_tile), lambda i: (0, i)),     # activations
        ],
        out_specs=pl.BlockSpec((8, cols_tile), lambda i: (0, i)),
        compiler_params=pltpu.CompilerParams(
            # Batch axis is embarrassingly parallel.
            # NOTE: on v7x, splitting this axis across the 2 TensorCores
            # (pltpu.CORE_PARALLEL or pl.core_map) would expose ~2x HBM BW;
            # kept as plain "parallel" here for v5e/v6e/v7x portability.
            dimension_semantics=("parallel",)),
    )(params, x_packed)

    # Row-major flatten of (8, pad_cols) is batch-ordered; slice off padding.
    return out.reshape(-1)[:n].reshape(n, 1)


def example_net_reference(x, w1, b1, w2, b2):
    h = jax.nn.sigmoid(x.astype(jnp.float32) @ w1.T + b1)
    return jax.nn.sigmoid(h @ w2.T + b2)


if __name__ == "__main__":
    # Deterministic parameters exactly as in the PyTorch module's __init__.
    w1 = jnp.array([[3.0, 2.0], [4.0, 3.0]], dtype=jnp.float32)   # (out=2, in=2)
    b1 = jnp.array([-2.0, -4.0], dtype=jnp.float32)               # (2,)
    w2 = jnp.array([[5.0, -5.0]], dtype=jnp.float32)              # (out=1, in=2)
    b2 = jnp.array([-2.0], dtype=jnp.float32)                     # (1,)
    params = pack_params(w1, b1, w2, b2)   # packed once, reused every call

    ref = lambda xx: example_net_reference(xx, w1, b1, w2, b2)

    # Deterministic small input, same shape as the module's XOR-style x.
    x = jax.random.uniform(jax.random.PRNGKey(0), (4, 2), dtype=jnp.float32)
    y = jax.block_until_ready(example_net_forward(x, params))
    assert y.shape == (4, 1), y.shape
    assert jnp.allclose(y, ref(x), atol=1e-5, rtol=1e-5), (y, ref(x))

    # Canonical XOR-style inputs from the original script.
    x_xor = jnp.array([[0.0, 0.0], [1.0, 0.0], [0.0, 1.0], [1.0, 1.0]],
                      dtype=jnp.float32)
    y_xor = jax.block_until_ready(example_net_forward(x_xor, params))
    assert jnp.allclose(y_xor, ref(x_xor), atol=1e-5, rtol=1e-5)

    # Non-multiple-of-8/128 batch: single grid step, sublane+lane packed.
    x_big = jax.random.uniform(jax.random.PRNGKey(1), (300, 2),
                               dtype=jnp.float32)
    y_big = jax.block_until_ready(example_net_forward(x_big, params))
    assert y_big.shape == (300, 1), y_big.shape
    assert jnp.allclose(y_big, ref(x_big), atol=1e-5, rtol=1e-5)

    # Exercise the multi-step grid path with a small forced tile (3 steps).
    x_grid = jax.random.uniform(jax.random.PRNGKey(2), (3000, 2),
                                dtype=jnp.float32)
    y_grid = jax.block_until_ready(
        example_net_forward(x_grid, params, max_tile_cols=128))
    assert y_grid.shape == (3000, 1), y_grid.shape
    assert jnp.allclose(y_grid, ref(x_grid), atol=1e-5, rtol=1e-5)

    print("KERNEL_OK")
</pallas_src>

<mosaic_0001>
module attributes {stable_mosaic.version = 11 : i64} {
  func.func @_mlp_kernel(%arg0: i32, %arg1: memref<9xf32, #tpu.memory_space<smem>>, %arg2: memref<16x128xf32, #tpu.memory_space<vmem>>, %arg3: memref<8x128xf32, #tpu.memory_space<vmem>>) attributes {dimension_semantics = [#tpu.dimension_semantics<parallel>], iteration_bounds = array<i64: 1>, scalar_prefetch = 0 : i64, scratch_operands = 0 : i64, tpu.core_type = #tpu.core_type<tc>, window_params = [{transform_indices = @transform_0, window_bounds = array<i64: 9>}, {transform_indices = @transform_1, window_bounds = array<i64: 16, 128>}, {transform_indices = @transform_2, window_bounds = array<i64: 8, 128>}]} {
    %c0 = arith.constant 0 : index
    %c0_0 = arith.constant 0 : index
    %0 = vector.load %arg2[%c0, %c0_0] : memref<16x128xf32, #tpu.memory_space<vmem>>, vector<8x128xf32>
    %c8 = arith.constant 8 : index
    %c0_1 = arith.constant 0 : index
    %1 = vector.load %arg2[%c8, %c0_1] : memref<16x128xf32, #tpu.memory_space<vmem>>, vector<8x128xf32>
    %c0_2 = arith.constant 0 : index
    %2 = memref.load %arg1[%c0_2] : memref<9xf32, #tpu.memory_space<smem>>
    %3 = vector.broadcast %2 : f32 to vector<8x128xf32>
    %4 = arith.mulf %0, %3 : vector<8x128xf32>
    %c1 = arith.constant 1 : index
    %5 = memref.load %arg1[%c1] : memref<9xf32, #tpu.memory_space<smem>>
    %6 = vector.broadcast %5 : f32 to vector<8x128xf32>
    %7 = arith.mulf %1, %6 : vector<8x128xf32>
    %8 = arith.addf %4, %7 : vector<8x128xf32>
    %c4 = arith.constant 4 : index
    %9 = memref.load %arg1[%c4] : memref<9xf32, #tpu.memory_space<smem>>
    %10 = vector.broadcast %9 : f32 to vector<8x128xf32>
    %11 = arith.addf %8, %10 : vector<8x128xf32>
    %12 = arith.negf %11 : vector<8x128xf32>
    %13 = math.exp %12 : vector<8x128xf32>
    %cst = arith.constant 1.000000e+00 : f32
    %14 = vector.broadcast %cst : f32 to vector<8x128xf32>
    %15 = arith.addf %14, %13 : vector<8x128xf32>
    %16 = arith.divf %14, %15 : vector<8x128xf32>
    %c2 = arith.constant 2 : index
    %17 = memref.load %arg1[%c2] : memref<9xf32, #tpu.memory_space<smem>>
    %18 = vector.broadcast %17 : f32 to vector<8x128xf32>
    %19 = arith.mulf %0, %18 : vector<8x128xf32>
    %c3 = arith.constant 3 : index
    %20 = memref.load %arg1[%c3] : memref<9xf32, #tpu.memory_space<smem>>
    %21 = vector.broadcast %20 : f32 to vector<8x128xf32>
    %22 = arith.mulf %1, %21 : vector<8x128xf32>
    %23 = arith.addf %19, %22 : vector<8x128xf32>
    %c5 = arith.constant 5 : index
    %24 = memref.load %arg1[%c5] : memref<9xf32, #tpu.memory_space<smem>>
    %25 = vector.broadcast %24 : f32 to vector<8x128xf32>
    %26 = arith.addf %23, %25 : vector<8x128xf32>
    %27 = arith.negf %26 : vector<8x128xf32>
    %28 = math.exp %27 : vector<8x128xf32>
    %cst_3 = arith.constant 1.000000e+00 : f32
    %29 = vector.broadcast %cst_3 : f32 to vector<8x128xf32>
    %30 = arith.addf %29, %28 : vector<8x128xf32>
    %31 = arith.divf %29, %30 : vector<8x128xf32>
    %c6 = arith.constant 6 : index
    %32 = memref.load %arg1[%c6] : memref<9xf32, #tpu.memory_space<smem>>
    %33 = vector.broadcast %32 : f32 to vector<8x128xf32>
    %34 = arith.mulf %16, %33 : vector<8x128xf32>
    %c7 = arith.constant 7 : index
    %35 = memref.load %arg1[%c7] : memref<9xf32, #tpu.memory_space<smem>>
    %36 = vector.broadcast %35 : f32 to vector<8x128xf32>
    %37 = arith.mulf %31, %36 : vector<8x128xf32>
    %38 = arith.addf %34, %37 : vector<8x128xf32>
    %c8_4 = arith.constant 8 : index
    %39 = memref.load %arg1[%c8_4] : memref<9xf32, #tpu.memory_space<smem>>
    %40 = vector.broadcast %39 : f32 to vector<8x128xf32>
    %41 = arith.addf %38, %40 : vector<8x128xf32>
    %42 = arith.negf %41 : vector<8x128xf32>
    %43 = math.exp %42 : vector<8x128xf32>
    %cst_5 = arith.constant 1.000000e+00 : f32
    %44 = vector.broadcast %cst_5 : f32 to vector<8x128xf32>
    %45 = arith.addf %44, %43 : vector<8x128xf32>
    %46 = arith.divf %44, %45 : vector<8x128xf32>
    %c0_6 = arith.constant 0 : index
    %c0_7 = arith.constant 0 : index
    %47 = vector.load %arg3[%c0_6, %c0_7] : memref<8x128xf32, #tpu.memory_space<vmem>>, vector<8x128xf32>
    tpu.vector_store %arg3[%c0_6, %c0_7], %46 {strides = array<i32>} : memref<8x128xf32, #tpu.memory_space<vmem>>, vector<8x128xf32>,
    return
  }
  func.func @transform_0(%arg0: i32) -> i32 {
    %c0_i32 = arith.constant 0 : i32
    %c0_i32_0 = arith.constant 0 : i32
    return %c0_i32 : i32
  }
  func.func @transform_1(%arg0: i32) -> (i32, i32) {
    %c0_i32 = arith.constant 0 : i32
    %c0_i32_0 = arith.constant 0 : i32
    return %c0_i32, %arg0 : i32, i32
  }
  func.func @transform_2(%arg0: i32) -> (i32, i32) {
    %c0_i32 = arith.constant 0 : i32
    %c0_i32_0 = arith.constant 0 : i32
    return %c0_i32, %arg0 : i32, i32
  }
}

</mosaic_0001>

<bundles_post_ra>
// kernel: example_net_forward.1
= control target key start
LH: loop header
LB: loop body
LE: loop exit
PB: predicated region body
PF: predicated region fallthrough
CT: control target
= control target key end

     0   :  { %7 = vsyncpa [#allocation3], 0  ;;  %s146_s0 = inlined_call_operand.vmem [shape: f32[9], index: 0, kind: input, shape index: {}]   ;;  %s147_s1 = inlined_call_operand.vmem [shape: f32[16,128], index: 1, kind: input, shape index: {}]   ;;  %s148_s2 = inlined_call_operand.vmem [shape: f32[8,128], index: 2, kind: output, shape index: {}]  }
   0x1   :  { %s14_s11 = sshll.u32 %s146_s0, 4  ;;  %s15_s11 = int_to_ptr.vmem [resolvable:$true] %s14_s11 }
   0x2   :  { %s104_s12 = scalar_lea.vmem %s15_s11, 16  ;;  %p109_p1 = scmp.lt.s32.totalorder %s15_s11, %s15_s11 }
   0x3   :  { %p105_p0 = scmp.ne.s32.totalorder %s15_s11, %s104_s12  ;;  %p110_p2 = scmp.lt.s32.totalorder %s104_s12, %s104_s12 }
   0x5   :  { %p111_p3 = por %p110_p2, %p109_p1 }
   0x7   :  { %p112_p4 = pnand %p111_p3, %p105_p0 }
   0x9   :  { %115 = shalt.err (!%p112_p4)
}
   0xa   :  { %s118_s13 = smov [#allocation2]  }
   0xb   :  { %17 = dma.vmem_to_smem %s15_s11, 16, %s118_s13, [#allocation3]  }
   0xc   :  { %116 = dma.done.wait [#allocation3], 16  }
   0xd   :  { %117 = vsyncadd [#allocation3], 4294967280 }
   0xe   :  { %23 = sfence }
   0xf   :  { %s26_s14 = sld [smem:[#allocation2]]  ;;  %s80_s15 = sld [smem:[#allocation2 + $0x1]]  ;;  %v24_v0 = vld [vmem:[%s147_s1] sm:$0xff]  ;;  %v25_v1 = vld [vmem:[%s147_s1 + $0x8] sm:$0xff] }
  0x10   :  { %s81_s16 = sld [smem:[#allocation2 + $0x4]]  ;;  %s83_s17 = sld [smem:[#allocation2 + $0x2]] }
  0x11   :  { %s84_s18 = sld [smem:[#allocation2 + $0x3]]  ;;  %s85_s19 = sld [smem:[#allocation2 + $0x5]] }
  0x12   :  { %s87_s1 = sld [smem:[#allocation2 + $0x6]]  ;;  %s88_s23 = sld [smem:[#allocation2 + $0x7]] }
  0x13   :  { %s89_s24 = sld [smem:[#allocation2 + $0x8]] }
  0x15   :  { %v27_v2 = vstv %s26_s14  ;;  %v30_v3 = vstv %s80_s15 }
  0x16   :  { %v28_v4 = vmul.f32 %v27_v2, %v24_v0  ;;  %v31_v5 = vmul.f32 %v30_v3, %v25_v1  ;;  %v43_v6 = vstv %s83_s17  ;;  %v34_v7 = vstv %s81_s16 }
  0x17   :  { %v44_v8 = vmul.f32 %v43_v6, %v24_v0  ;;  %v46_v9 = vstv %s84_s18  ;;  %v50_v12 = vstv %s85_s19 }
  0x18   :  { %v32_v10 = vadd.f32 %v31_v5, %v28_v4  ;;  %v47_v11 = vmul.f32 %v46_v9, %v25_v1  ;;  %v59_v22 = vstv %s87_s1  ;;  %v62_v24 = vstv %s88_s23 }
  0x19   :  { %v66_v28 = vstv %s89_s24 }
  0x1a   :  { %v35_v13 = vadd.f32 %v34_v7, %v32_v10  ;;  %v48_v14 = vadd.f32 %v47_v11, %v44_v8 }
  0x1c   :  { %v82_v15 = vmul.f32 -1.442695, %v35_v13  ;;  %v51_v16 = vadd.f32 %v50_v12, %v48_v14 }
  0x1e   :  { %92 = vpow2.f32 %v82_v15  ;;  %v86_v17 = vmul.f32 -1.442695, %v51_v16 }
  0x20   :  { %94 = vpow2.f32 %v86_v17 }
  0x28   :  { %v93_v18 = vpop.eup %92 }
  0x29   :  { %v39_v19 = vadd.f32 1.0, %v93_v18 }
  0x2a   :  { %v95_v20 = vpop.eup %94 }
  0x2b   :  { %96 = vrcp.f32 %v39_v19  ;;  %v55_v21 = vadd.f32 1.0, %v95_v20 }
  0x2d   :  { %98 = vrcp.f32 %v55_v21 }
  0x35   :  { %v97_v23 = vpop.eup %96 }
  0x36   :  { %v60_v25 = vmul.f32 %v97_v23, %v59_v22 }
  0x37   :  { %v99_v26 = vpop.eup %98 }
  0x38   :  { %v63_v27 = vmul.f32 %v99_v26, %v62_v24 }
  0x3a   :  { %v64_v29 = vadd.f32 %v63_v27, %v60_v25 }
  0x3c   :  { %v67_v30 = vadd.f32 %v66_v28, %v64_v29 }
  0x3e   :  { %v90_v31 = vmul.f32 -1.442695, %v67_v30 }
  0x40   :  { %100 = vpow2.f32 %v90_v31 }
  0x4a   :  { %v101_v32 = vpop.eup %100 }
  0x4b   :  { %v71_v33 = vadd.f32 1.0, %v101_v32 }
  0x4d   :  { %102 = vrcp.f32 %v71_v33 }
  0x57   :  { %v103_v34 = vpop.eup %102 }
  0x58   :  { %74 = vst [vmem:[%s148_s2] sm:$0xff] %v103_v34 }
  0x59   :  { %79 = vsyncpa [#allocation3], 1 }

</bundles_post_ra>
